<compile_context>
chip_gen: v5e
topology: v5e:2x2
jax: 0.10.0
libtpu: 0.0.40
codegen_flags: <defaults>
</compile_context>

<pallas_src>
import jax
import jax.numpy as jnp
from jax.experimental import pallas as pl
from jax.experimental.pallas import tpu as pltpu


def _fused_conv1x1_kernel(params_ref, x_ref, o_ref):
    # params_ref: SMEM (12,) f32 = [w1_0, w1_1, w1_2, b1, w2_0..3, b2_0..3]
    # x_ref: (3, TILE_P) f32   — pixels on lanes, channels on sublanes
    # o_ref: (4, TILE_P) f32
    v1 = (x_ref[0:1, :] * params_ref[0]
          + x_ref[1:2, :] * params_ref[1]
          + x_ref[2:3, :] * params_ref[2]
          + params_ref[3])                       # conv1 (1x1, 3->1) as VPU FMAs
    v3 = jnp.minimum(jnp.maximum(v1, 0.45), 0.26)  # clamp_min(0.45) then clamp_max(0.26)
    for c in range(4):                           # conv2 (1x1, 1->4) as VPU FMAs
        o_ref[c:c + 1, :] = v3 * params_ref[4 + c] + params_ref[8 + c]


def fused_forward(x_nchw, w1, b1, w2, b2, *, tile_p=8192):
    """x_nchw: (N, 3, H, W) float32.  Returns (N, 4, H, W) float32."""
    N, Cin, H, W = x_nchw.shape
    assert Cin == 3
    Cout = 4
    P = H * W

    # NCHW consumed directly as (N, C, P): pixels become the lane axis.
    x = x_nchw.reshape(N, Cin, P)

    # Lane-dense tiling over pixels: tile_p multiple of 128, pad P if needed.
    p_pad128 = pl.cdiv(P, 128) * 128
    tile_p = min(tile_p, p_pad128)
    p_pad = pl.cdiv(P, tile_p) * tile_p
    if p_pad != P:
        x = jnp.pad(x, ((0, 0), (0, 0), (0, p_pad - P)))

    # All 12 weight/bias scalars in one SMEM-resident vector.
    params = jnp.concatenate([
        w1.reshape(-1).astype(jnp.float32),   # (3,)
        b1.reshape(-1).astype(jnp.float32),   # (1,)
        w2.reshape(-1).astype(jnp.float32),   # (4,)
        b2.reshape(-1).astype(jnp.float32),   # (4,)
    ])

    grid = (N, p_pad // tile_p)

    out = pl.pallas_call(
        _fused_conv1x1_kernel,
        out_shape=jax.ShapeDtypeStruct((N, Cout, p_pad), jnp.float32),
        grid_spec=pltpu.PrefetchScalarGridSpec(
            num_scalar_prefetch=0,
            grid=grid,
            in_specs=[
                pl.BlockSpec(memory_space=pltpu.MemorySpace.SMEM),   # params (12,)
                pl.BlockSpec((None, Cin, tile_p), lambda n, p: (n, 0, p)),
            ],
            out_specs=pl.BlockSpec((None, Cout, tile_p), lambda n, p: (n, 0, p)),
        ),
        compiler_params=pltpu.CompilerParams(
            dimension_semantics=("parallel", "parallel")),
    )(params, x)

    if p_pad != P:
        out = out[:, :, :P]
    return out.reshape(N, Cout, H, W)


def _init_params(key):
    """Deterministic Conv2d-style init (uniform +/- 1/sqrt(fan_in))."""
    k1, k2, k3, k4 = jax.random.split(key, 4)
    bound1 = 1.0 / (3 ** 0.5)   # fan_in = 3*1*1
    bound2 = 1.0                # fan_in = 1*1*1
    w1 = jax.random.uniform(k1, (1, 3, 1, 1), jnp.float32, -bound1, bound1)
    b1 = jax.random.uniform(k2, (1,), jnp.float32, -bound1, bound1)
    w2 = jax.random.uniform(k3, (4, 1, 1, 1), jnp.float32, -bound2, bound2)
    b2 = jax.random.uniform(k4, (4,), jnp.float32, -bound2, bound2)
    return w1, b1, w2, b2


if __name__ == "__main__":
    key = jax.random.PRNGKey(0)
    kx, kp = jax.random.split(key)

    # Small shape consistent with the module (input channels fixed at 3 by conv1).
    x = jax.random.normal(kx, (2, 3, 16, 16), jnp.float32)
    w1, b1, w2, b2 = _init_params(kp)

    out = fused_forward(x, w1, b1, w2, b2)
    out = jax.block_until_ready(out)

    # Plain-JAX reference for a sanity check.
    v1 = jnp.einsum("nchw,oc->nohw", x, w1.reshape(1, 3)) + b1.reshape(1, 1, 1, 1)
    v3 = jnp.minimum(jnp.maximum(v1, 0.45), 0.26)
    ref = jnp.einsum("nchw,oc->nohw", v3, w2.reshape(4, 1)) + b2.reshape(1, 4, 1, 1)

    assert out.shape == (2, 4, 16, 16)
    assert jnp.allclose(out, ref, atol=1e-5, rtol=1e-5)

    print("KERNEL_OK")
</pallas_src>

<mosaic_0001>
module attributes {stable_mosaic.version = 11 : i64} {
  func.func @_fused_conv1x1_kernel(%arg0: i32, %arg1: i32, %arg2: memref<12xf32, #tpu.memory_space<smem>>, %arg3: memref<1x3x256xf32, #tpu.memory_space<vmem>>, %arg4: memref<1x4x256xf32, #tpu.memory_space<vmem>>) attributes {dimension_semantics = [#tpu.dimension_semantics<parallel>, #tpu.dimension_semantics<parallel>], iteration_bounds = array<i64: 2, 1>, scalar_prefetch = 0 : i64, scratch_operands = 0 : i64, tpu.core_type = #tpu.core_type<tc>, window_params = [{transform_indices = @transform_0, window_bounds = array<i64: 12>}, {transform_indices = @transform_1, window_bounds = array<i64: 1, 3, 256>}, {transform_indices = @transform_2, window_bounds = array<i64: 1, 4, 256>}]} {
    %c0 = arith.constant 0 : index
    %c0_0 = arith.constant 0 : index
    %c0_1 = arith.constant 0 : index
    %0 = vector.load %arg3[%c0, %c0_0, %c0_1] : memref<1x3x256xf32, #tpu.memory_space<vmem>>, vector<1x1x256xf32>
    %1 = vector.shape_cast %0 : vector<1x1x256xf32> to vector<1x256xf32>
    %c0_2 = arith.constant 0 : index
    %2 = memref.load %arg2[%c0_2] : memref<12xf32, #tpu.memory_space<smem>>
    %3 = vector.broadcast %2 : f32 to vector<1x256xf32>
    %4 = arith.mulf %1, %3 : vector<1x256xf32>
    %c0_3 = arith.constant 0 : index
    %c1 = arith.constant 1 : index
    %c0_4 = arith.constant 0 : index
    %5 = vector.load %arg3[%c0_3, %c1, %c0_4] : memref<1x3x256xf32, #tpu.memory_space<vmem>>, vector<1x1x256xf32>
    %6 = vector.shape_cast %5 : vector<1x1x256xf32> to vector<1x256xf32>
    %c1_5 = arith.constant 1 : index
    %7 = memref.load %arg2[%c1_5] : memref<12xf32, #tpu.memory_space<smem>>
    %8 = vector.broadcast %7 : f32 to vector<1x256xf32>
    %9 = arith.mulf %6, %8 : vector<1x256xf32>
    %10 = arith.addf %4, %9 : vector<1x256xf32>
    %c0_6 = arith.constant 0 : index
    %c2 = arith.constant 2 : index
    %c0_7 = arith.constant 0 : index
    %11 = vector.load %arg3[%c0_6, %c2, %c0_7] : memref<1x3x256xf32, #tpu.memory_space<vmem>>, vector<1x1x256xf32>
    %12 = vector.shape_cast %11 : vector<1x1x256xf32> to vector<1x256xf32>
    %c2_8 = arith.constant 2 : index
    %13 = memref.load %arg2[%c2_8] : memref<12xf32, #tpu.memory_space<smem>>
    %14 = vector.broadcast %13 : f32 to vector<1x256xf32>
    %15 = arith.mulf %12, %14 : vector<1x256xf32>
    %16 = arith.addf %10, %15 : vector<1x256xf32>
    %c3 = arith.constant 3 : index
    %17 = memref.load %arg2[%c3] : memref<12xf32, #tpu.memory_space<smem>>
    %18 = vector.broadcast %17 : f32 to vector<1x256xf32>
    %19 = arith.addf %16, %18 : vector<1x256xf32>
    %cst = arith.constant 4.500000e-01 : f32
    %20 = vector.broadcast %cst : f32 to vector<1x256xf32>
    %21 = arith.maximumf %19, %20 : vector<1x256xf32>
    %cst_9 = arith.constant 2.600000e-01 : f32
    %22 = vector.broadcast %cst_9 : f32 to vector<1x256xf32>
    %23 = arith.minimumf %21, %22 : vector<1x256xf32>
    %c4 = arith.constant 4 : index
    %24 = memref.load %arg2[%c4] : memref<12xf32, #tpu.memory_space<smem>>
    %25 = vector.broadcast %24 : f32 to vector<1x256xf32>
    %26 = arith.mulf %23, %25 : vector<1x256xf32>
    %c8 = arith.constant 8 : index
    %27 = memref.load %arg2[%c8] : memref<12xf32, #tpu.memory_space<smem>>
    %28 = vector.broadcast %27 : f32 to vector<1x256xf32>
    %29 = arith.addf %26, %28 : vector<1x256xf32>
    %c0_10 = arith.constant 0 : index
    %c0_11 = arith.constant 0 : index
    %c0_12 = arith.constant 0 : index
    %30 = vector.load %arg4[%c0_10, %c0_11, %c0_12] : memref<1x4x256xf32, #tpu.memory_space<vmem>>, vector<1x1x256xf32>
    %31 = vector.shape_cast %30 : vector<1x1x256xf32> to vector<1x256xf32>
    %32 = vector.shape_cast %29 : vector<1x256xf32> to vector<1x1x256xf32>
    tpu.vector_store %arg4[%c0_10, %c0_11, %c0_12], %32 {strides = array<i32>} : memref<1x4x256xf32, #tpu.memory_space<vmem>>, vector<1x1x256xf32>,
    %c5 = arith.constant 5 : index
    %33 = memref.load %arg2[%c5] : memref<12xf32, #tpu.memory_space<smem>>
    %34 = vector.broadcast %33 : f32 to vector<1x256xf32>
    %35 = arith.mulf %23, %34 : vector<1x256xf32>
    %c9 = arith.constant 9 : index
    %36 = memref.load %arg2[%c9] : memref<12xf32, #tpu.memory_space<smem>>
    %37 = vector.broadcast %36 : f32 to vector<1x256xf32>
    %38 = arith.addf %35, %37 : vector<1x256xf32>
    %c0_13 = arith.constant 0 : index
    %c1_14 = arith.constant 1 : index
    %c0_15 = arith.constant 0 : index
    %39 = vector.load %arg4[%c0_13, %c1_14, %c0_15] : memref<1x4x256xf32, #tpu.memory_space<vmem>>, vector<1x1x256xf32>
    %40 = vector.shape_cast %39 : vector<1x1x256xf32> to vector<1x256xf32>
    %41 = vector.shape_cast %38 : vector<1x256xf32> to vector<1x1x256xf32>
    tpu.vector_store %arg4[%c0_13, %c1_14, %c0_15], %41 {strides = array<i32>} : memref<1x4x256xf32, #tpu.memory_space<vmem>>, vector<1x1x256xf32>,
    %c6 = arith.constant 6 : index
    %42 = memref.load %arg2[%c6] : memref<12xf32, #tpu.memory_space<smem>>
    %43 = vector.broadcast %42 : f32 to vector<1x256xf32>
    %44 = arith.mulf %23, %43 : vector<1x256xf32>
    %c10 = arith.constant 10 : index
    %45 = memref.load %arg2[%c10] : memref<12xf32, #tpu.memory_space<smem>>
    %46 = vector.broadcast %45 : f32 to vector<1x256xf32>
    %47 = arith.addf %44, %46 : vector<1x256xf32>
    %c0_16 = arith.constant 0 : index
    %c2_17 = arith.constant 2 : index
    %c0_18 = arith.constant 0 : index
    %48 = vector.load %arg4[%c0_16, %c2_17, %c0_18] : memref<1x4x256xf32, #tpu.memory_space<vmem>>, vector<1x1x256xf32>
    %49 = vector.shape_cast %48 : vector<1x1x256xf32> to vector<1x256xf32>
    %50 = vector.shape_cast %47 : vector<1x256xf32> to vector<1x1x256xf32>
    tpu.vector_store %arg4[%c0_16, %c2_17, %c0_18], %50 {strides = array<i32>} : memref<1x4x256xf32, #tpu.memory_space<vmem>>, vector<1x1x256xf32>,
    %c7 = arith.constant 7 : index
    %51 = memref.load %arg2[%c7] : memref<12xf32, #tpu.memory_space<smem>>
    %52 = vector.broadcast %51 : f32 to vector<1x256xf32>
    %53 = arith.mulf %23, %52 : vector<1x256xf32>
    %c11 = arith.constant 11 : index
    %54 = memref.load %arg2[%c11] : memref<12xf32, #tpu.memory_space<smem>>
    %55 = vector.broadcast %54 : f32 to vector<1x256xf32>
    %56 = arith.addf %53, %55 : vector<1x256xf32>
    %c0_19 = arith.constant 0 : index
    %c3_20 = arith.constant 3 : index
    %c0_21 = arith.constant 0 : index
    %57 = vector.load %arg4[%c0_19, %c3_20, %c0_21] : memref<1x4x256xf32, #tpu.memory_space<vmem>>, vector<1x1x256xf32>
    %58 = vector.shape_cast %57 : vector<1x1x256xf32> to vector<1x256xf32>
    %59 = vector.shape_cast %56 : vector<1x256xf32> to vector<1x1x256xf32>
    tpu.vector_store %arg4[%c0_19, %c3_20, %c0_21], %59 {strides = array<i32>} : memref<1x4x256xf32, #tpu.memory_space<vmem>>, vector<1x1x256xf32>,
    return
  }
  func.func @transform_0(%arg0: i32, %arg1: i32) -> i32 {
    %c0_i32 = arith.constant 0 : i32
    %c0_i32_0 = arith.constant 0 : i32
    return %c0_i32 : i32
  }
  func.func @transform_1(%arg0: i32, %arg1: i32) -> (i32, i32, i32) {
    %c0_i32 = arith.constant 0 : i32
    %c0_i32_0 = arith.constant 0 : i32
    return %arg0, %c0_i32, %arg1 : i32, i32, i32
  }
  func.func @transform_2(%arg0: i32, %arg1: i32) -> (i32, i32, i32) {
    %c0_i32 = arith.constant 0 : i32
    %c0_i32_0 = arith.constant 0 : i32
    return %arg0, %c0_i32, %arg1 : i32, i32, i32
  }
}

</mosaic_0001>

<bundles_post_ra>
// kernel: tpu_custom_call.1
= control target key start
LH: loop header
LB: loop body
LE: loop exit
PB: predicated region body
PF: predicated region fallthrough
CT: control target
= control target key end

     0   :  { %7 = vsyncpa [#allocation4], 0  ;;  %s677_s0 = inlined_call_operand.vmem [shape: f32[12], index: 0, kind: input, shape index: {}]   ;;  %s678_s1 = inlined_call_operand.vmem [shape: f32[2,3,256], index: 1, kind: input, shape index: {}]   ;;  %s679_s2 = inlined_call_operand.hbm [shape: f32[2,4,256], index: 2, kind: output, shape index: {}]  }
   0x1   :  { %8 = vsyncpa [#allocation3], 0 }
   0x2   :  { %10 = vsyncpa [#allocation3 + $0x1], 0  ;;  %s564_s9 = smov 0   ;;  %s566_s10 = smov 0  }
   0x3   :  { %s568_s11 = smov 0   ;;  %s570_s12 = smov 0  }
   0x4   :  { %s572_s13 = smov 0   ;;  %s574_s14 = smov 0  }
   0x5 LB: > { %s350_s15 = sadd.s32 4294967295, %s546_s14   ;;  %s351_s16 = sadd.s32 4294967294, %s546_s14   ;;  %s546_s14 = sphi %s574_s14, %s16_s14   ;;  %s542_s13 = sphi %s572_s13, %s686_s13   ;;  %s538_s12 = sphi %s570_s12, %s685_s12   ;;  %s534_s11 = sphi %s568_s11, %s684_s11   ;;  %s530_s10 = sphi %s566_s10, %s683_s10   ;;  %s526_s9 = sphi %s564_s9, %s682_s9  }
   0x6   : > { %s28_s17 = sadd.s32 1, %s542_s13  ;;  %s86_s18 = sadd.s32 1, %s534_s11 }
   0x7   : > { %p30_p0 = scmp.ge.s32.totalorder %s28_s17, 2  ;;  %p96_p1 = scmp.ne.s32.totalorder %s534_s11, %s530_s10 }
   0x8   : > { %p97_p2 = scmp.eq.s32.totalorder %s350_s15, 1  ;;  %p102_p3 = scmp.ne.s32.totalorder %s530_s10, %s526_s9 }
   0x9   : > { %s688_s17 = smov (%p30_p0, %s28_s17), 0  ;;  %p103_p5 = scmp.eq.s32.totalorder %s351_s16, 1 }
   0xa   : > { %p604_p4 = por %p97_p2, %p96_p1  ;;  %s81_s20 = ssub.s32 %s542_s13, %s688_s17 }
   0xb   : > { %p352_p6 = scmp.ge.s32.totalorder %s546_s14, 1  ;;  %p84_p7 = scmp.eq.s32.totalorder %s81_s20, 0 }
   0xc   : > { %p611_p8 = por %p103_p5, %p102_p3  ;;  %p110_p9 = scmp.lt.s32.totalorder %s546_s14, 3 }
   0xd   : > { %s617_s22 = scalar_select %p84_p7, %s534_s11, %s86_s18  }
   0xe   : > { %p111_p10 = pnand %p352_p6, %p110_p9  ;;  %p397_p11 = scmp.eq.s32.totalorder %s350_s15, 0 }
   0xf   : > { %s122_s25 = sshll.u32 %s677_s0, 4  ;;  %s548_s26 = smov [#allocation2]   ;;  %s123_s25 = int_to_ptr.vmem [resolvable:$true] %s122_s25 }
  0x10   : > { %p389_p12 = pneg %p111_p10  ;;  %148 = sbr.rel (%p111_p10) target bundleno = 54 (0x36), region = 28 }
  0x12   : > { %p390_p13 = pnand %p397_p11, %p389_p12 }
  0x14   : > { %392 = dma.vmem_to_smem (!%p390_p13), %s123_s25, 16, %s548_s26, [#allocation4]  }
  0x15   : > { %517 = dma.done.wait (%p397_p11), [#allocation4], 16  }
  0x16   : > { %519 = vsyncadd (%p397_p11), [#allocation4], 4294967280 }
  0x17   : > { %155 = sfence }
  0x18   : > { %p177_p0 = scmp.lt.s32.totalorder %s538_s12, 1  ;;  %s188_s27 = sld [smem:[#allocation2]]  ;;  %v214_v15 = vlaneseq }
  0x19   : > { %s361_s28 = sld [smem:[#allocation2 + $0x1]]  ;;  %s173_s25 = sand.u32 1, %s530_s10  }
  0x1a   : > { %s178_s29 = scalar_select %p177_p0, %s538_s12, 1  ;;  %vm216_vm0 = vcmp.lt.s32.totalorder %v214_v15, 256 }
  0x1b   : > { %s363_s30 = sld [smem:[#allocation2 + $0x2]]  ;;  %s244_s6 = scalar_lea.sflag [#allocation3], %s173_s25 }
  0x1c   : > { %s381_s3 = sshll.u32 %s178_s29, 3  ;;  %s364_s4 = sld [smem:[#allocation2 + $0x3]] }
  0x1d   : > { %s184_s7 = scalar_lea.vmem %s678_s1, %s381_s3  ;;  %s627_s8 = sld [smem:[#allocation2 + $0x4]] }
  0x1e   : > { %v187_v0 = vld [vmem:[%s184_s7] ss:$4 sm:$0x3]  ;;  %v189_v1 = vstv %s188_s27  ;;  %v360_v2 = vld [vmem:[%s184_s7 + $0x1] ss:$4 sm:$0x3] }
  0x1f   : > { %v190_v3 = vmul.f32 %v189_v1, %v187_v0  ;;  %v194_v4 = vstv %s361_s28  ;;  %v362_v5 = vld [vmem:[%s184_s7 + $0x2] ss:$4 sm:$0x3]  ;;  %s629_s15 = sld [smem:[#allocation2 + $0x8]]  ;;  %s357_s27 = sshll.u32 %s173_s25, 3 }
  0x20   : > { %v195_v6 = vmul.f32 %v360_v2, %v194_v4  ;;  %s367_s16 = sld [smem:[#allocation2 + $0x5]]  ;;  %s382_s28 = sshll.u32 %s538_s12, 3 }
  0x21   : > { %v200_v7 = vstv %s363_s30  ;;  %s631_s18 = sld [smem:[#allocation2 + $0x9]]  ;;  %s257_s3 = scalar_lea.hbm %s679_s2, %s382_s28 }
  0x22   : > { %v196_v8 = vadd.f32 %v195_v6, %v190_v3  ;;  %v201_v9 = vmul.f32 %v362_v5, %v200_v7  ;;  %s370_s20 = sld [smem:[#allocation2 + $0x6]]  ;;  %v204_v10 = vstv %s364_s4  ;;  %s175_s12 = scalar_lea.vmem [#allocation5], %s357_s27 }
  0x23   : > { %s371_s23 = sld [smem:[#allocation2 + $0xa]]  ;;  %v209_v14 = vstv %s627_s8  ;;  %s259_s4 = sshll.u32 %s175_s12, 4  ;;  %s260_s4 = int_to_ptr.vmem [resolvable:$true] %s259_s4 }
  0x24   : > { %v202_v11 = vadd.f32 %v201_v9, %v196_v8  ;;  %s373_s24 = sld [smem:[#allocation2 + $0x7]]  ;;  %s261_s5 = sshll.u32 %s257_s3, 4  ;;  %s262_s5 = int_to_ptr.hbm [resolvable:$true] %s261_s5 }
  0x25   : > { %s374_s26 = sld [smem:[#allocation2 + $0xb]]  ;;  %v212_v20 = vstv %s629_s15  ;;  %s478_s7 = sshra.s32 %s262_s5, 4  ;;  %s479_s7 = int_to_ptr.hbm [resolvable:$true] %s478_s7 }
  0x26   : > { %v205_v12 = vadd.f32 %v204_v10, %v202_v11  ;;  %v220_v16 = vstv %s367_s16  ;;  %s480_s8 = scalar_lea.hbm %s479_s7, 8  ;;  %p485_p5 = scmp.lt.s32.totalorder %s479_s7, %s679_s2 }
  0x27   : > { %v223_v21 = vstv %s631_s18  ;;  %p481_p1 = scmp.ne.s32.totalorder %s479_s7, %s480_s8  ;;  %s484_s18 = scalar_lea.hbm %s679_s2, 16 }
  0x28   : > { %v206_v13 = vmax.f32 %v205_v12, 0.45  ;;  %v228_v17 = vstv %s370_s20  ;;  %p486_p6 = scmp.lt.s32.totalorder %s484_s18, %s480_s8 }
  0x29   : > { %v231_v22 = vstv %s371_s23  ;;  %p482_p2 = pnand %p481_p1, %p604_p4 }
  0x2a   : > { %v207_v18 = vmin.f32 %v206_v13, 0.26  ;;  %v236_v19 = vstv %s373_s24  ;;  %p487_p7 = por %p486_p6, %p485_p5 }
  0x2b   : > { %v239_v23 = vstv %s374_s26  ;;  %p483_p3 = pneg %p482_p2 }
  0x2c   : > { %v210_v24 = vmul.f32 %v209_v14, %v207_v18  ;;  %v221_v25 = vmul.f32 %v220_v16, %v207_v18  ;;  %v229_v26 = vmul.f32 %v228_v17, %v207_v18  ;;  %v237_v27 = vmul.f32 %v236_v19, %v207_v18 }
  0x2d   : > { %p488_p9 = pnand %p487_p7, %p483_p3 }
  0x2e   : > { %v213_v28 = vadd.f32 %v212_v20, %v210_v24  ;;  %v224_v29 = vadd.f32 %v223_v21, %v221_v25  ;;  %v232_v30 = vadd.f32 %v231_v22, %v229_v26  ;;  %v240_v31 = vadd.f32 %v239_v23, %v237_v27 }
  0x30   : > { %218 = vst.msk [vmem:[%s175_s12] ss:$4 sm:$0x3] %vm216_vm0, %v213_v28 }
  0x31   : > { %369 = vst.msk [vmem:[%s175_s12 + $0x1] ss:$4 sm:$0x3] %vm216_vm0, %v224_v29 }
  0x32   : > { %372 = vst.msk [vmem:[%s175_s12 + $0x2] ss:$4 sm:$0x3] %vm216_vm0, %v232_v30 }
  0x33   : > { %375 = vst.msk [vmem:[%s175_s12 + $0x3] ss:$4 sm:$0x3] %vm216_vm0, %v240_v31 }
  0x34   : > { %491 = shalt.err (!%p488_p9)
}
  0x35   : > { %387 = dma.vmem_to_hbm [thread:$0]  (%p604_p4), %s260_s4, 128, %s262_s5, %s244_s6  }
  0x36 PF: > { %p399_p10 = scmp.ge.s32.totalorder %s546_s14, 2  ;;  %s273_s24 = sand.u32 1, %s526_s9  }
  0x37   : > { %s274_s25 = scalar_lea.sflag [#allocation3], %s273_s24 }
  0x38   : > { %p394_p11 = pnand %p399_p10, %p611_p8 }
  0x3a   : > { %p395_p12 = pneg %p394_p11 }
  0x3c   : > { %521 = dma.done.wait (%p395_p12), %s274_s25, 128  }
  0x3d   : > { %523 = vsyncadd (%p395_p12), %s274_s25, 4294967168  ;;  %s16_s14 = sadd.s32 1, %s546_s14   ;;  %s682_s9 = smov %s530_s10 }
  0x3e   : > { %p13_p13 = scmp.ge.s32.totalorder %s16_s14, 4   ;;  %s683_s10 = smov %s534_s11 }
  0x3f   : > { %s684_s11 = smov %s617_s22  ;;  %s685_s12 = smov %s542_s13 }
  0x40   : > { %s686_s13 = smov %s688_s17  ;;  %15 = sbr.rel (!%p13_p13) target bundleno = 5 (0x5), region = 73 }
  0x45   :  { %280 = vsyncpa [#allocation3], 1 }
  0x46   :  { %282 = vsyncpa [#allocation3 + $0x1], 1 }
  0x47   :  { %283 = vsyncpa [#allocation4], 1 }
  0x48   :  { %285 = vsyncpa [#allocation4 + $0x1], 1 }

</bundles_post_ra>
